<compile_context>
chip_gen: v6e
topology: v6e:2x2x1
jax: 0.10.0
libtpu: 0.0.40
codegen_flags: <defaults>
</compile_context>

<pallas_src>
import math
from functools import partial

import jax
import jax.numpy as jnp
from jax.experimental import pallas as pl
from jax.experimental.pallas import tpu as pltpu


def _round_up(x, m):
    return (x + m - 1) // m * m


def _gelu_tanh(x):
    # tanh-approx GELU: |err| vs exact GELU <= ~1e-3, well inside validation tolerance.
    c = math.sqrt(2.0 / math.pi)
    return 0.5 * x * (1.0 + jnp.tanh(c * (x + 0.044715 * x * x * x)))


# --------------------------------------------------------------------------------------
# Kernels
# --------------------------------------------------------------------------------------
def _cross_fusion_kernel_fm(xt_ref, xp_ref, w_in_ref, w_ep_ref, b_ref, o_ref,
                            *, D, P, Dr, H, Dp):
    """Feature-major kernel: packed row-major projection -> one relayout -> epilogue
    with batch on the 128-lane axis -> lane-dense [Dp, tb] store."""
    H4 = 4 * H
    # Packed first pass: A = [tf | pf | gate_lin | attn_out], N = 4H = 128 lanes.
    a = (jnp.dot(xt_ref[...], w_in_ref[0:D, :], preferred_element_type=jnp.float32) +
         jnp.dot(xp_ref[...], w_in_ref[Dr:Dr + P, :], preferred_element_type=jnp.float32))
    # Single relayout to feature-major (batch -> lanes) for the whole epilogue.
    a = a.T + b_ref[0:H4, :]                                   # [4H, tb]
    tf = a[0:H, :]
    pf = a[H:2 * H, :]
    gate = jax.nn.sigmoid(a[2 * H:3 * H, :])
    fused = pf + gate * (tf - pf) + a[3 * H:4 * H, :]          # gated fusion + residual
    # LayerNorm over the feature (sublane) axis; affine folded into w1/b1.
    mu = jnp.sum(fused, axis=0, keepdims=True) * (1.0 / H)
    d = fused - mu
    var = jnp.sum(d * d, axis=0, keepdims=True) * (1.0 / H)
    z = d * jax.lax.rsqrt(var + 1e-5)
    # output_proj: Linear(H,H) -> GELU(tanh) -> Linear(H,Dp), all feature-major.
    h = jnp.dot(w_ep_ref[0:H, :], z, preferred_element_type=jnp.float32) + b_ref[H4:H4 + H, :]
    g = _gelu_tanh(h)
    o_ref[...] = (jnp.dot(w_ep_ref[H:H + Dp, :], g, preferred_element_type=jnp.float32) +
                  b_ref[H4 + H:H4 + H + Dp, :])


def _cross_fusion_kernel_rm(x_ref, w_in_ref, w_ep_ref, b_ref, o_ref, *, H, Dp):
    """Row-major fallback kernel (previously-validated lowering patterns only)."""
    a = jnp.dot(x_ref[...], w_in_ref[...], preferred_element_type=jnp.float32) + b_ref[0:1, :]
    tf = a[:, 0:H]
    pf = a[:, H:2 * H]
    gate = jax.nn.sigmoid(a[:, 2 * H:3 * H])
    fused = pf + gate * (tf - pf) + a[:, 3 * H:4 * H]
    mu = jnp.mean(fused, axis=-1, keepdims=True)
    d = fused - mu
    var = jnp.mean(d * d, axis=-1, keepdims=True)
    z = d * jax.lax.rsqrt(var + 1e-5)
    h = jnp.dot(z, w_ep_ref[:, 0:H], preferred_element_type=jnp.float32) + b_ref[1:2, 0:H]
    g = _gelu_tanh(h)
    o_ref[...] = (jnp.dot(g, w_ep_ref[:, H:H + Dp], preferred_element_type=jnp.float32) +
                  b_ref[2:3, 0:Dp])


# --------------------------------------------------------------------------------------
# Wrapper
# --------------------------------------------------------------------------------------
_FM_OK = None  # lazily resolved: does the feature-major kernel lower on this backend?


def _pick_tile(B, batch_tile):
    """Batch tile: multiple of 8; a multiple of 128 whenever it actually tiles (keeps the
    lane-dense feature-major output block legal); capped at 1024; >=2 grid steps for
    large B so v7x's two TensorCores both get work."""
    b8 = _round_up(B, 8)
    if batch_tile is None:
        if B <= 256:
            return b8
        return min(1024, _round_up((B + 1) // 2, 128))
    tb = _round_up(int(batch_tile), 8)
    if tb >= b8:
        return b8
    return _round_up(tb, 128)


def cross_fusion(trend, period, packed, *, batch_tile=None):
    global _FM_OK
    B, D = trend.shape
    P = period.shape[1]
    H = packed["w_ep_fm"].shape[1]
    Dp = packed["w_ep_fm"].shape[0] - H
    Dr, Pr = _round_up(D, 8), _round_up(P, 8)

    tb = _pick_tile(B, batch_tile)
    B_pad = _round_up(B, tb)
    grid = (B_pad // tb,)
    cparams = pltpu.CompilerParams(dimension_semantics=("parallel",))

    if _FM_OK is not False:
        try:
            t = trend.astype(jnp.float32)
            p = period.astype(jnp.float32)
            if B_pad > B:
                t = jnp.pad(t, ((0, B_pad - B), (0, 0)))
                p = jnp.pad(p, ((0, B_pad - B), (0, 0)))
            kernel = partial(_cross_fusion_kernel_fm, D=D, P=P, Dr=Dr, H=H, Dp=Dp)
            out_fm = pl.pallas_call(
                kernel,
                out_shape=jax.ShapeDtypeStruct((Dp, B_pad), jnp.float32),
                grid=grid,
                in_specs=[
                    pl.BlockSpec((tb, D), lambda i: (i, 0)),
                    pl.BlockSpec((tb, P), lambda i: (i, 0)),
                    # constant index_maps -> parameter slabs stay VMEM-resident
                    pl.BlockSpec(packed["w_in"].shape, lambda i: (0, 0)),
                    pl.BlockSpec(packed["w_ep_fm"].shape, lambda i: (0, 0)),
                    pl.BlockSpec(packed["b_fm"].shape, lambda i: (0, 0)),
                ],
                out_specs=pl.BlockSpec((Dp, tb), lambda i: (0, i)),
                compiler_params=cparams,
            )(t, p, packed["w_in"], packed["w_ep_fm"], packed["b_fm"])
            if _FM_OK is None:
                jax.block_until_ready(out_fm)  # surface lowering/runtime errors once
                _FM_OK = True
            # TODO(synk): callers that can consume feature-major [D, B] should skip this
            # transpose (the only remaining wrapper-side data movement on this path).
            return out_fm[:D, :B].T
        except Exception:
            _FM_OK = False

    # ---------------- Row-major fallback path ----------------
    x = jnp.zeros((B_pad, Dr + Pr), jnp.float32)
    x = x.at[:B, 0:D].set(trend.astype(jnp.float32))
    x = x.at[:B, Dr:Dr + P].set(period.astype(jnp.float32))
    kernel = partial(_cross_fusion_kernel_rm, H=H, Dp=Dp)
    out = pl.pallas_call(
        kernel,
        out_shape=jax.ShapeDtypeStruct((B_pad, Dp), jnp.float32),
        grid=grid,
        in_specs=[
            pl.BlockSpec((tb, Dr + Pr), lambda i: (i, 0)),
            pl.BlockSpec(packed["w_in"].shape, lambda i: (0, 0)),
            pl.BlockSpec(packed["w_ep_rm"].shape, lambda i: (0, 0)),
            pl.BlockSpec(packed["b_rm"].shape, lambda i: (0, 0)),
        ],
        out_specs=pl.BlockSpec((tb, Dp), lambda i: (i, 0)),
        compiler_params=cparams,
    )(x, packed["w_in"], packed["w_ep_rm"], packed["b_rm"])
    return out[:B, :D]


# --------------------------------------------------------------------------------------
# Parameters (deterministic init, packing, pure-JAX reference)
# --------------------------------------------------------------------------------------
def init_params(key, trend_dim=7, period_dim=7, hidden_dim=32):
    """Xavier-normal weights / zero biases, LayerNorm = (1, 0).
    Weights stored as [in_features, out_features]."""
    D, P, H = trend_dim, period_dim, hidden_dim
    keys = jax.random.split(key, 7)

    def xavier(k, fan_in, fan_out):
        std = math.sqrt(2.0 / (fan_in + fan_out))
        return std * jax.random.normal(k, (fan_in, fan_out), jnp.float32)

    z = lambda n: jnp.zeros((n,), jnp.float32)
    return dict(
        wt=xavier(keys[0], D, H), bt=z(H),
        wp=xavier(keys[1], P, H), bp=z(H),
        wv=xavier(keys[2], H, H), bv=z(H),      # MHA V in-projection slice
        wo=xavier(keys[3], H, H), bo=z(H),      # MHA out_proj
        wg=xavier(keys[4], 2 * H, H), bg=z(H),  # gate_net Linear(2H, H)
        gamma=jnp.ones((H,), jnp.float32), beta=z(H),
        w1=xavier(keys[5], H, H), b1=z(H),
        w2=xavier(keys[6], H, D), b2=z(D),
    )


def pack_params(params, trend_dim=7, period_dim=7, hidden_dim=32):
    """Fold eval-mode constants and pack into slabs for both kernel layouts."""
    D, P, H = trend_dim, period_dim, hidden_dim
    Dr, Pr, Dp = _round_up(D, 8), _round_up(P, 8), _round_up(D, 8)
    f32 = jnp.float32

    wt, bt = params["wt"], params["bt"]
    wp, bp = params["wp"], params["bp"]
    wvo = params["wv"] @ params["wo"]                      # [H, H]
    bvo = params["bv"] @ params["wo"] + params["bo"]       # [H]
    wg_t, wg_p = params["wg"][:H, :], params["wg"][H:, :]

    # First-pass packed projections: A = [tf | pf | gate_lin | attn_out] (4H columns).
    zD = jnp.zeros((D, H), f32)
    zP = jnp.zeros((P, H), f32)
    wt_pack = jnp.concatenate([wt, zD, wt @ wg_t, zD], axis=1)               # [D, 4H]
    wp_pack = jnp.concatenate([zP, wp, wp @ wg_p, wp @ wvo], axis=1)         # [P, 4H]
    b_a = jnp.concatenate([bt, bp,
                           bt @ wg_t + bp @ wg_p + params["bg"],
                           bp @ wvo + bvo])                                  # [4H]

    w_in = jnp.zeros((Dr + Pr, 4 * H), f32)
    w_in = w_in.at[0:D, :].set(wt_pack).at[Dr:Dr + P, :].set(wp_pack)

    # LayerNorm affine folded into the first output-proj Linear.
    w1f = params["w1"] * params["gamma"][:, None]           # [H, H]
    b1f = params["beta"] @ params["w1"] + params["b1"]      # [H]
    w2p = jnp.zeros((H, Dp), f32).at[:, 0:D].set(params["w2"])
    b2p = jnp.zeros((Dp,), f32).at[0:D].set(params["b2"])

    w_ep_fm = jnp.concatenate([w1f.T, w2p.T], axis=0)       # [H + Dp, H]
    b_fm = jnp.concatenate([b_a, b1f, b2p])[:, None]        # [4H + H + Dp, 1]
    w_ep_rm = jnp.concatenate([w1f, w2p], axis=1)           # [H, H + Dp]
    b_rm = jnp.zeros((3, 4 * H), f32)
    b_rm = b_rm.at[0, :].set(b_a).at[1, 0:H].set(b1f).at[2, 0:Dp].set(b2p)

    return dict(w_in=w_in, w_ep_fm=w_ep_fm, b_fm=b_fm, w_ep_rm=w_ep_rm, b_rm=b_rm)


def cross_fusion_ref(trend, period, params):
    """Pure-JAX reference of the eval-mode PyTorch forward (for validation)."""
    tf = trend @ params["wt"] + params["bt"]
    pf = period @ params["wp"] + params["bp"]
    v = pf @ params["wv"] + params["bv"]
    attn = v @ params["wo"] + params["bo"]
    gate = jax.nn.sigmoid(jnp.concatenate([tf, pf], -1) @ params["wg"] + params["bg"])
    fused = gate * tf + (1.0 - gate) * pf + attn
    mu = fused.mean(-1, keepdims=True)
    var = ((fused - mu) ** 2).mean(-1, keepdims=True)
    normed = (fused - mu) * jax.lax.rsqrt(var + 1e-5) * params["gamma"] + params["beta"]
    h = jax.nn.gelu(normed @ params["w1"] + params["b1"], approximate=False)
    return h @ params["w2"] + params["b2"]


# --------------------------------------------------------------------------------------
# Self-test
# --------------------------------------------------------------------------------------
if __name__ == "__main__":
    key = jax.random.PRNGKey(0)
    k_t, k_p, k_w, k_t2, k_p2 = jax.random.split(key, 5)

    B, D, H = 8, 7, 32          # batch, pred_steps (= trend_dim = period_dim), hidden_dim
    trend_feat = jax.random.normal(k_t, (B, D), jnp.float32)
    period_feat = jax.random.normal(k_p, (B, D), jnp.float32)

    params = init_params(k_w, trend_dim=D, period_dim=D, hidden_dim=H)
    packed = pack_params(params, trend_dim=D, period_dim=D, hidden_dim=H)

    out = cross_fusion(trend_feat, period_feat, packed)
    jax.block_until_ready(out)
    assert out.shape == (B, D) and out.dtype == jnp.float32
    assert bool(jnp.all(jnp.isfinite(out)))
    ref = cross_fusion_ref(trend_feat, period_feat, params)
    assert bool(jnp.allclose(out, ref, atol=1e-2, rtol=1e-2))

    # Also exercise the tiled path (multi-step grid + batch padding) at a small shape.
    B2 = 384
    trend2 = jax.random.normal(k_t2, (B2, D), jnp.float32)
    period2 = jax.random.normal(k_p2, (B2, D), jnp.float32)
    out2 = cross_fusion(trend2, period2, packed)
    jax.block_until_ready(out2)
    ref2 = cross_fusion_ref(trend2, period2, params)
    assert out2.shape == (B2, D)
    assert bool(jnp.allclose(out2, ref2, atol=1e-2, rtol=1e-2))

    print("KERNEL_OK")
</pallas_src>

<mosaic_0001>
module attributes {stable_mosaic.version = 11 : i64} {
  func.func @_cross_fusion_kernel_fm(%arg0: i32, %arg1: memref<8x7xf32, #tpu.memory_space<vmem>>, %arg2: memref<8x7xf32, #tpu.memory_space<vmem>>, %arg3: memref<16x128xf32, #tpu.memory_space<vmem>>, %arg4: memref<40x32xf32, #tpu.memory_space<vmem>>, %arg5: memref<168x1xf32, #tpu.memory_space<vmem>>, %arg6: memref<8x8xf32, #tpu.memory_space<vmem>>) attributes {dimension_semantics = [#tpu.dimension_semantics<parallel>], iteration_bounds = array<i64: 1>, scalar_prefetch = 0 : i64, scratch_operands = 0 : i64, tpu.core_type = #tpu.core_type<tc>, window_params = [{transform_indices = @transform_0, window_bounds = array<i64: 8, 7>}, {transform_indices = @transform_1, window_bounds = array<i64: 8, 7>}, {pipeline_mode = #tpu.pipeline_mode<synchronous>, transform_indices = @transform_2, window_bounds = array<i64: 16, 128>}, {pipeline_mode = #tpu.pipeline_mode<synchronous>, transform_indices = @transform_3, window_bounds = array<i64: 40, 32>}, {pipeline_mode = #tpu.pipeline_mode<synchronous>, transform_indices = @transform_4, window_bounds = array<i64: 168, 1>}, {transform_indices = @transform_5, window_bounds = array<i64: 8, 8>}]} {
    %c0 = arith.constant 0 : index
    %c0_0 = arith.constant 0 : index
    %0 = vector.load %arg1[%c0, %c0_0] : memref<8x7xf32, #tpu.memory_space<vmem>>, vector<8x7xf32>
    %c0_1 = arith.constant 0 : index
    %c0_2 = arith.constant 0 : index
    %1 = vector.load %arg3[%c0_1, %c0_2] : memref<16x128xf32, #tpu.memory_space<vmem>>, vector<7x128xf32>
    %cst = arith.constant dense<0.000000e+00> : vector<8x128xf32>
    %2 = tpu.matmul %0, %1, %cst {dimension_numbers = #tpu.dot_dimension_numbers<[1], [0], [0], [1], [0, 0, 1, 1], [], []>} : vector<8x7xf32>, vector<7x128xf32>, vector<8x128xf32> -> vector<8x128xf32>
    %c0_3 = arith.constant 0 : index
    %c0_4 = arith.constant 0 : index
    %3 = vector.load %arg2[%c0_3, %c0_4] : memref<8x7xf32, #tpu.memory_space<vmem>>, vector<8x7xf32>
    %c8 = arith.constant 8 : index
    %c0_5 = arith.constant 0 : index
    %4 = vector.load %arg3[%c8, %c0_5] : memref<16x128xf32, #tpu.memory_space<vmem>>, vector<7x128xf32>
    %cst_6 = arith.constant dense<0.000000e+00> : vector<8x128xf32>
    %5 = tpu.matmul %3, %4, %cst_6 {dimension_numbers = #tpu.dot_dimension_numbers<[1], [0], [0], [1], [0, 0, 1, 1], [], []>} : vector<8x7xf32>, vector<7x128xf32>, vector<8x128xf32> -> vector<8x128xf32>
    %6 = arith.addf %2, %5 : vector<8x128xf32>
    %7 = tpu.transpose %6, [1, 0] : vector<8x128xf32> -> vector<128x8xf32>
    %c0_7 = arith.constant 0 : index
    %c0_8 = arith.constant 0 : index
    %8 = vector.load %arg5[%c0_7, %c0_8] : memref<168x1xf32, #tpu.memory_space<vmem>>, vector<128x1xf32>
    %9 = vector.broadcast %8 : vector<128x1xf32> to vector<128x8xf32>
    %10 = arith.addf %7, %9 : vector<128x8xf32>
    %11 = vector.extract_strided_slice %10 {offsets = [0, 0], sizes = [32, 8], strides = [1, 1]} : vector<128x8xf32> to vector<32x8xf32>
    %12 = vector.extract_strided_slice %10 {offsets = [32, 0], sizes = [32, 8], strides = [1, 1]} : vector<128x8xf32> to vector<32x8xf32>
    %13 = vector.extract_strided_slice %10 {offsets = [64, 0], sizes = [32, 8], strides = [1, 1]} : vector<128x8xf32> to vector<32x8xf32>
    %14 = arith.negf %13 : vector<32x8xf32>
    %15 = math.exp %14 : vector<32x8xf32>
    %cst_9 = arith.constant 1.000000e+00 : f32
    %16 = vector.broadcast %cst_9 : f32 to vector<32x8xf32>
    %17 = arith.addf %16, %15 : vector<32x8xf32>
    %18 = arith.divf %16, %17 : vector<32x8xf32>
    %19 = arith.subf %11, %12 : vector<32x8xf32>
    %20 = arith.mulf %18, %19 : vector<32x8xf32>
    %21 = arith.addf %12, %20 : vector<32x8xf32>
    %22 = vector.extract_strided_slice %10 {offsets = [96, 0], sizes = [32, 8], strides = [1, 1]} : vector<128x8xf32> to vector<32x8xf32>
    %23 = arith.addf %21, %22 : vector<32x8xf32>
    %cst_10 = arith.constant dense<0.000000e+00> : vector<8xf32>
    %24 = vector.multi_reduction <add>, %23, %cst_10 [0] : vector<32x8xf32> to vector<8xf32>
    %25 = vector.shape_cast %24 : vector<8xf32> to vector<1x8xf32>
    %cst_11 = arith.constant 3.125000e-02 : f32
    %26 = vector.broadcast %cst_11 : f32 to vector<1x8xf32>
    %27 = arith.mulf %25, %26 : vector<1x8xf32>
    %28 = vector.broadcast %27 : vector<1x8xf32> to vector<32x8xf32>
    %29 = arith.subf %23, %28 : vector<32x8xf32>
    %30 = arith.mulf %29, %29 : vector<32x8xf32>
    %cst_12 = arith.constant dense<0.000000e+00> : vector<8xf32>
    %31 = vector.multi_reduction <add>, %30, %cst_12 [0] : vector<32x8xf32> to vector<8xf32>
    %32 = vector.shape_cast %31 : vector<8xf32> to vector<1x8xf32>
    %cst_13 = arith.constant 3.125000e-02 : f32
    %33 = vector.broadcast %cst_13 : f32 to vector<1x8xf32>
    %34 = arith.mulf %32, %33 : vector<1x8xf32>
    %cst_14 = arith.constant 9.99999974E-6 : f32
    %35 = vector.broadcast %cst_14 : f32 to vector<1x8xf32>
    %36 = arith.addf %34, %35 : vector<1x8xf32>
    %37 = math.rsqrt %36 : vector<1x8xf32>
    %38 = vector.broadcast %37 : vector<1x8xf32> to vector<32x8xf32>
    %39 = arith.mulf %29, %38 : vector<32x8xf32>
    %c0_15 = arith.constant 0 : index
    %c0_16 = arith.constant 0 : index
    %40 = vector.load %arg4[%c0_15, %c0_16] : memref<40x32xf32, #tpu.memory_space<vmem>>, vector<32x32xf32>
    %cst_17 = arith.constant dense<0.000000e+00> : vector<32x8xf32>
    %41 = tpu.matmul %40, %39, %cst_17 {dimension_numbers = #tpu.dot_dimension_numbers<[1], [0], [0], [1], [0, 0, 1, 1], [], []>} : vector<32x32xf32>, vector<32x8xf32>, vector<32x8xf32> -> vector<32x8xf32>
    %c128 = arith.constant 128 : index
    %c0_18 = arith.constant 0 : index
    %42 = vector.load %arg5[%c128, %c0_18] : memref<168x1xf32, #tpu.memory_space<vmem>>, vector<32x1xf32>
    %43 = vector.broadcast %42 : vector<32x1xf32> to vector<32x8xf32>
    %44 = arith.addf %41, %43 : vector<32x8xf32>
    %cst_19 = arith.constant 5.000000e-01 : f32
    %45 = vector.broadcast %cst_19 : f32 to vector<32x8xf32>
    %46 = arith.mulf %45, %44 : vector<32x8xf32>
    %cst_20 = arith.constant 4.471500e-02 : f32
    %47 = vector.broadcast %cst_20 : f32 to vector<32x8xf32>
    %48 = arith.mulf %47, %44 : vector<32x8xf32>
    %49 = arith.mulf %48, %44 : vector<32x8xf32>
    %50 = arith.mulf %49, %44 : vector<32x8xf32>
    %51 = arith.addf %44, %50 : vector<32x8xf32>
    %cst_21 = arith.constant 0.797884583 : f32
    %52 = vector.broadcast %cst_21 : f32 to vector<32x8xf32>
    %53 = arith.mulf %52, %51 : vector<32x8xf32>
    %54 = math.tanh %53 : vector<32x8xf32>
    %cst_22 = arith.constant 1.000000e+00 : f32
    %55 = vector.broadcast %cst_22 : f32 to vector<32x8xf32>
    %56 = arith.addf %55, %54 : vector<32x8xf32>
    %57 = arith.mulf %46, %56 : vector<32x8xf32>
    %c32 = arith.constant 32 : index
    %c0_23 = arith.constant 0 : index
    %58 = vector.load %arg4[%c32, %c0_23] : memref<40x32xf32, #tpu.memory_space<vmem>>, vector<8x32xf32>
    %cst_24 = arith.constant dense<0.000000e+00> : vector<8x8xf32>
    %59 = tpu.matmul %58, %57, %cst_24 {dimension_numbers = #tpu.dot_dimension_numbers<[1], [0], [0], [1], [0, 0, 1, 1], [], []>} : vector<8x32xf32>, vector<32x8xf32>, vector<8x8xf32> -> vector<8x8xf32>
    %c160 = arith.constant 160 : index
    %c0_25 = arith.constant 0 : index
    %60 = vector.load %arg5[%c160, %c0_25] : memref<168x1xf32, #tpu.memory_space<vmem>>, vector<8x1xf32>
    %61 = vector.broadcast %60 : vector<8x1xf32> to vector<8x8xf32>
    %62 = arith.addf %59, %61 : vector<8x8xf32>
    %c0_26 = arith.constant 0 : index
    %c0_27 = arith.constant 0 : index
    %63 = vector.load %arg6[%c0_26, %c0_27] : memref<8x8xf32, #tpu.memory_space<vmem>>, vector<8x8xf32>
    tpu.vector_store %arg6[%c0_26, %c0_27], %62 {strides = array<i32>} : memref<8x8xf32, #tpu.memory_space<vmem>>, vector<8x8xf32>,
    return
  }
  func.func @transform_0(%arg0: i32) -> (i32, i32) {
    %c0_i32 = arith.constant 0 : i32
    %c0_i32_0 = arith.constant 0 : i32
    return %arg0, %c0_i32 : i32, i32
  }
  func.func @transform_1(%arg0: i32) -> (i32, i32) {
    %c0_i32 = arith.constant 0 : i32
    %c0_i32_0 = arith.constant 0 : i32
    return %arg0, %c0_i32 : i32, i32
  }
  func.func @transform_2(%arg0: i32) -> (i32, i32) {
    %c0_i32 = arith.constant 0 : i32
    %c0_i32_0 = arith.constant 0 : i32
    %c0_i32_1 = arith.constant 0 : i32
    return %c0_i32, %c0_i32_0 : i32, i32
  }
  func.func @transform_3(%arg0: i32) -> (i32, i32) {
    %c0_i32 = arith.constant 0 : i32
    %c0_i32_0 = arith.constant 0 : i32
    %c0_i32_1 = arith.constant 0 : i32
    return %c0_i32, %c0_i32_0 : i32, i32
  }
  func.func @transform_4(%arg0: i32) -> (i32, i32) {
    %c0_i32 = arith.constant 0 : i32
    %c0_i32_0 = arith.constant 0 : i32
    %c0_i32_1 = arith.constant 0 : i32
    return %c0_i32, %c0_i32_0 : i32, i32
  }
  func.func @transform_5(%arg0: i32) -> (i32, i32) {
    %c0_i32 = arith.constant 0 : i32
    %c0_i32_0 = arith.constant 0 : i32
    return %c0_i32, %arg0 : i32, i32
  }
}

module attributes {stable_mosaic.version = 11 : i64} {
  func.func @_cross_fusion_kernel_rm(%arg0: i32, %arg1: memref<8x16xf32, #tpu.memory_space<vmem>>, %arg2: memref<16x128xf32, #tpu.memory_space<vmem>>, %arg3: memref<32x40xf32, #tpu.memory_space<vmem>>, %arg4: memref<3x128xf32, #tpu.memory_space<vmem>>, %arg5: memref<8x8xf32, #tpu.memory_space<vmem>>) attributes {dimension_semantics = [#tpu.dimension_semantics<parallel>], iteration_bounds = array<i64: 1>, scalar_prefetch = 0 : i64, scratch_operands = 0 : i64, tpu.core_type = #tpu.core_type<tc>, window_params = [{transform_indices = @transform_0, window_bounds = array<i64: 8, 16>}, {pipeline_mode = #tpu.pipeline_mode<synchronous>, transform_indices = @transform_1, window_bounds = array<i64: 16, 128>}, {pipeline_mode = #tpu.pipeline_mode<synchronous>, transform_indices = @transform_2, window_bounds = array<i64: 32, 40>}, {pipeline_mode = #tpu.pipeline_mode<synchronous>, transform_indices = @transform_3, window_bounds = array<i64: 3, 128>}, {transform_indices = @transform_4, window_bounds = array<i64: 8, 8>}]} {
    %c0 = arith.constant 0 : index
    %c0_0 = arith.constant 0 : index
    %0 = vector.load %arg1[%c0, %c0_0] : memref<8x16xf32, #tpu.memory_space<vmem>>, vector<8x16xf32>
    %c0_1 = arith.constant 0 : index
    %c0_2 = arith.constant 0 : index
    %1 = vector.load %arg2[%c0_1, %c0_2] : memref<16x128xf32, #tpu.memory_space<vmem>>, vector<16x128xf32>
    %cst = arith.constant dense<0.000000e+00> : vector<8x128xf32>
    %2 = tpu.matmul %0, %1, %cst {dimension_numbers = #tpu.dot_dimension_numbers<[1], [0], [0], [1], [0, 0, 1, 1], [], []>} : vector<8x16xf32>, vector<16x128xf32>, vector<8x128xf32> -> vector<8x128xf32>
    %c0_3 = arith.constant 0 : index
    %c0_4 = arith.constant 0 : index
    %3 = vector.load %arg4[%c0_3, %c0_4] : memref<3x128xf32, #tpu.memory_space<vmem>>, vector<1x128xf32>
    %4 = vector.broadcast %3 : vector<1x128xf32> to vector<8x128xf32>
    %5 = arith.addf %2, %4 : vector<8x128xf32>
    %6 = vector.extract_strided_slice %5 {offsets = [0, 0], sizes = [8, 32], strides = [1, 1]} : vector<8x128xf32> to vector<8x32xf32>
    %7 = vector.extract_strided_slice %5 {offsets = [0, 32], sizes = [8, 32], strides = [1, 1]} : vector<8x128xf32> to vector<8x32xf32>
    %8 = vector.extract_strided_slice %5 {offsets = [0, 64], sizes = [8, 32], strides = [1, 1]} : vector<8x128xf32> to vector<8x32xf32>
    %9 = arith.negf %8 : vector<8x32xf32>
    %10 = math.exp %9 : vector<8x32xf32>
    %cst_5 = arith.constant 1.000000e+00 : f32
    %11 = vector.broadcast %cst_5 : f32 to vector<8x32xf32>
    %12 = arith.addf %11, %10 : vector<8x32xf32>
    %13 = arith.divf %11, %12 : vector<8x32xf32>
    %14 = arith.subf %6, %7 : vector<8x32xf32>
    %15 = arith.mulf %13, %14 : vector<8x32xf32>
    %16 = arith.addf %7, %15 : vector<8x32xf32>
    %17 = vector.extract_strided_slice %5 {offsets = [0, 96], sizes = [8, 32], strides = [1, 1]} : vector<8x128xf32> to vector<8x32xf32>
    %18 = arith.addf %16, %17 : vector<8x32xf32>
    %cst_6 = arith.constant dense<0.000000e+00> : vector<8xf32>
    %19 = vector.multi_reduction <add>, %18, %cst_6 [1] : vector<8x32xf32> to vector<8xf32>
    %20 = vector.shape_cast %19 : vector<8xf32> to vector<8x1xf32>
    %cst_7 = arith.constant 3.200000e+01 : f32
    %21 = vector.broadcast %cst_7 : f32 to vector<8x1xf32>
    %22 = arith.divf %20, %21 : vector<8x1xf32>
    %23 = vector.broadcast %22 : vector<8x1xf32> to vector<8x32xf32>
    %24 = arith.subf %18, %23 : vector<8x32xf32>
    %25 = arith.mulf %24, %24 : vector<8x32xf32>
    %cst_8 = arith.constant dense<0.000000e+00> : vector<8xf32>
    %26 = vector.multi_reduction <add>, %25, %cst_8 [1] : vector<8x32xf32> to vector<8xf32>
    %27 = vector.shape_cast %26 : vector<8xf32> to vector<8x1xf32>
    %cst_9 = arith.constant 3.200000e+01 : f32
    %28 = vector.broadcast %cst_9 : f32 to vector<8x1xf32>
    %29 = arith.divf %27, %28 : vector<8x1xf32>
    %cst_10 = arith.constant 9.99999974E-6 : f32
    %30 = vector.broadcast %cst_10 : f32 to vector<8x1xf32>
    %31 = arith.addf %29, %30 : vector<8x1xf32>
    %32 = math.rsqrt %31 : vector<8x1xf32>
    %33 = vector.broadcast %32 : vector<8x1xf32> to vector<8x32xf32>
    %34 = arith.mulf %24, %33 : vector<8x32xf32>
    %c0_11 = arith.constant 0 : index
    %c0_12 = arith.constant 0 : index
    %35 = vector.load %arg3[%c0_11, %c0_12] : memref<32x40xf32, #tpu.memory_space<vmem>>, vector<32x32xf32>
    %cst_13 = arith.constant dense<0.000000e+00> : vector<8x32xf32>
    %36 = tpu.matmul %34, %35, %cst_13 {dimension_numbers = #tpu.dot_dimension_numbers<[1], [0], [0], [1], [0, 0, 1, 1], [], []>} : vector<8x32xf32>, vector<32x32xf32>, vector<8x32xf32> -> vector<8x32xf32>
    %c1 = arith.constant 1 : index
    %c0_14 = arith.constant 0 : index
    %37 = vector.load %arg4[%c1, %c0_14] : memref<3x128xf32, #tpu.memory_space<vmem>>, vector<1x32xf32>
    %38 = vector.broadcast %37 : vector<1x32xf32> to vector<8x32xf32>
    %39 = arith.addf %36, %38 : vector<8x32xf32>
    %cst_15 = arith.constant 5.000000e-01 : f32
    %40 = vector.broadcast %cst_15 : f32 to vector<8x32xf32>
    %41 = arith.mulf %40, %39 : vector<8x32xf32>
    %cst_16 = arith.constant 4.471500e-02 : f32
    %42 = vector.broadcast %cst_16 : f32 to vector<8x32xf32>
    %43 = arith.mulf %42, %39 : vector<8x32xf32>
    %44 = arith.mulf %43, %39 : vector<8x32xf32>
    %45 = arith.mulf %44, %39 : vector<8x32xf32>
    %46 = arith.addf %39, %45 : vector<8x32xf32>
    %cst_17 = arith.constant 0.797884583 : f32
    %47 = vector.broadcast %cst_17 : f32 to vector<8x32xf32>
    %48 = arith.mulf %47, %46 : vector<8x32xf32>
    %49 = math.tanh %48 : vector<8x32xf32>
    %cst_18 = arith.constant 1.000000e+00 : f32
    %50 = vector.broadcast %cst_18 : f32 to vector<8x32xf32>
    %51 = arith.addf %50, %49 : vector<8x32xf32>
    %52 = arith.mulf %41, %51 : vector<8x32xf32>
    %c0_19 = arith.constant 0 : index
    %c32 = arith.constant 32 : index
    %53 = vector.load %arg3[%c0_19, %c32] : memref<32x40xf32, #tpu.memory_space<vmem>>, vector<32x8xf32>
    %cst_20 = arith.constant dense<0.000000e+00> : vector<8x8xf32>
    %54 = tpu.matmul %52, %53, %cst_20 {dimension_numbers = #tpu.dot_dimension_numbers<[1], [0], [0], [1], [0, 0, 1, 1], [], []>} : vector<8x32xf32>, vector<32x8xf32>, vector<8x8xf32> -> vector<8x8xf32>
    %c2 = arith.constant 2 : index
    %c0_21 = arith.constant 0 : index
    %55 = vector.load %arg4[%c2, %c0_21] : memref<3x128xf32, #tpu.memory_space<vmem>>, vector<1x8xf32>
    %56 = vector.broadcast %55 : vector<1x8xf32> to vector<8x8xf32>
    %57 = arith.addf %54, %56 : vector<8x8xf32>
    %c0_22 = arith.constant 0 : index
    %c0_23 = arith.constant 0 : index
    %58 = vector.load %arg5[%c0_22, %c0_23] : memref<8x8xf32, #tpu.memory_space<vmem>>, vector<8x8xf32>
    tpu.vector_store %arg5[%c0_22, %c0_23], %57 {strides = array<i32>} : memref<8x8xf32, #tpu.memory_space<vmem>>, vector<8x8xf32>,
    return
  }
  func.func @transform_0(%arg0: i32) -> (i32, i32) {
    %c0_i32 = arith.constant 0 : i32
    %c0_i32_0 = arith.constant 0 : i32
    return %arg0, %c0_i32 : i32, i32
  }
  func.func @transform_1(%arg0: i32) -> (i32, i32) {
    %c0_i32 = arith.constant 0 : i32
    %c0_i32_0 = arith.constant 0 : i32
    %c0_i32_1 = arith.constant 0 : i32
    return %c0_i32, %c0_i32_0 : i32, i32
  }
  func.func @transform_2(%arg0: i32) -> (i32, i32) {
    %c0_i32 = arith.constant 0 : i32
    %c0_i32_0 = arith.constant 0 : i32
    %c0_i32_1 = arith.constant 0 : i32
    return %c0_i32, %c0_i32_0 : i32, i32
  }
  func.func @transform_3(%arg0: i32) -> (i32, i32) {
    %c0_i32 = arith.constant 0 : i32
    %c0_i32_0 = arith.constant 0 : i32
    %c0_i32_1 = arith.constant 0 : i32
    return %c0_i32, %c0_i32_0 : i32, i32
  }
  func.func @transform_4(%arg0: i32) -> (i32, i32) {
    %c0_i32 = arith.constant 0 : i32
    %c0_i32_0 = arith.constant 0 : i32
    return %arg0, %c0_i32 : i32, i32
  }
}

</mosaic_0001>

<bundles_post_ra>
// kernel: tpu_custom_call.1
= control target key start
LH: loop header
LB: loop body
LE: loop exit
PB: predicated region body
PF: predicated region fallthrough
CT: control target
= control target key end

     0   :  { %vm29_vm0 = vcmask 1046528   ;;  %v782_v1 = vmov 0.0   ;;  %vm25_vm1 = vcmask 56320   ;;  %vm783_vm2 = vmmov 0   ;;  %s935_s0 = inlined_call_operand.vmem [shape: f32[8,7], index: 0, kind: input, shape index: {}]   ;;  %s936_s1 = inlined_call_operand.vmem [shape: f32[8,7], index: 1, kind: input, shape index: {}]   ;;  %s937_s2 = inlined_call_operand.vmem [shape: f32[16,128], index: 2, kind: input, shape index: {}]   ;;  %s938_s3 = inlined_call_operand.vmem [shape: f32[40,32], index: 3, kind: input, shape index: {}]   ;;  %s939_s4 = inlined_call_operand.vmem [shape: f32[168,1], index: 4, kind: input, shape index: {}]   ;;  %s940_s5 = inlined_call_operand.hbm [shape: f32[8,8], index: 5, kind: output, shape index: {}]  }
   0x1   :  { %v24_v0 = vld [vmem:[%s937_s2 + $0x8] sm:$0x7f]  ;;  %693 = vmatprep.subr.mxu0 %v782_v1  ;;  %698 = vmatprep.subr.mxu1 %v782_v1  ;;  %v22_v2 = vld [vmem:[%s937_s2] sm:$0x7f]  ;;  %v221_v6 = vld [vmem:[%s939_s4 + $0x50] sm:$0xff] }
   0x2   :  { %v23_v3 = vld [vmem:[%s936_s1] sm:$0xff]  ;;  %694 = vmatpush3.msk.msra.mxu0 %vm29_vm0, %v24_v0  ;;  %695 = vmatprep.mubr.msk.f32.mxu0 %vm783_vm2, %v782_v1 }
   0x3   :  { %v21_v4 = vld [vmem:[%s935_s0] sm:$0xff]  ;;  %699 = vmatpush3.msk.msra.mxu1 %vm29_vm0, %v22_v2  ;;  %700 = vmatprep.mubr.msk.f32.mxu1 %vm783_vm2, %v782_v1 }
   0x4   :  { %v219_v5 = vld [vmem:[%s939_s4 + $0x40] sm:$0xff] }
   0x5   :  { %10 = vsyncpa [#allocation3], 0  ;;  %696 = vmatmul.mubr.msk.f32.vlgmr.msra.gmra.mxu0 %vm25_vm1, %v23_v3  ;;  %701 = vmatmul.mubr.msk.f32.vlgmr.msra.gmra.mxu1 %vm25_vm1, %v21_v4  ;;  %v784_v7 = vmov 0   ;;  %v220_v8 = vld [vmem:[%s939_s4 + $0x48] sm:$0xff]  ;;  %v222_v9 = vld [vmem:[%s939_s4 + $0x58] sm:$0xff]  ;;  %vm434_vm3 = vcmask 261120  }
   0x6   :  { %732 = vset.pattern.permute.xlu0 %v784_v7  ;;  %733 = vset.pattern.permute.xlu1 %v784_v7  ;;  %v211_v10 = vld [vmem:[%s939_s4] sm:$0xff]  ;;  %v212_v11 = vld [vmem:[%s939_s4 + $0x8] sm:$0xff]  ;;  %v213_v14 = vld [vmem:[%s939_s4 + $0x10] sm:$0xff]  ;;  %vm363_vm4 = vcmask 64512   ;;  %s785_s21 = smov [#allocation2]  }
   0x7   :  { %269 = vperm.xlu0 %732, %v219_v5   ;;  %279 = vperm.xlu1 %733, %v221_v6   ;;  %v215_v12 = vld [vmem:[%s939_s4 + $0x20] sm:$0xff]  ;;  %v216_v13 = vld [vmem:[%s939_s4 + $0x28] sm:$0xff]  ;;  %v217_v15 = vld [vmem:[%s939_s4 + $0x30] sm:$0xff]  ;;  %s655_s22 = sshll.u32 %s785_s21, 4  ;;  %s656_s22 = int_to_ptr.vmem [resolvable:$true] %s655_s22 }
   0x8   :  { %717 = vmatprep.subr.mxu1 %v782_v1  ;;  %725 = vmatprep.mubr.msk.f32.mxu1 %vm783_vm2, %v782_v1  ;;  %v214_v16 = vld [vmem:[%s939_s4 + $0x18] sm:$0xff]  ;;  %v224_v18 = vld [vmem:[%s939_s4 + $0x68] sm:$0xff]  ;;  %v225_v19 = vld [vmem:[%s939_s4 + $0x70] sm:$0xff]  ;;  %s760_s23 = scalar_lea.vmem %s656_s22, 128  ;;  %p765_p1 = scmp.lt.s32.totalorder %s656_s22, %s656_s22 }
   0x9   :  { %v218_v17 = vld [vmem:[%s939_s4 + $0x38] sm:$0xff]  ;;  %v412_v22 = vld [vmem:[%s939_s4 + $0x90] sm:$0xff]  ;;  %v411_v23 = vld [vmem:[%s939_s4 + $0x88] sm:$0xff]  ;;  %p761_p0 = scmp.ne.s32.totalorder %s656_s22, %s760_s23  ;;  %p766_p2 = scmp.lt.s32.totalorder %s760_s23, %s760_s23 }
   0xa   :  { %v226_v20 = vld [vmem:[%s939_s4 + $0x78] sm:$0xff]  ;;  %v410_v24 = vld [vmem:[%s939_s4 + $0x80] sm:$0xff] }
   0xb   :  { %274 = vperm.xlu0 %732, %v220_v8   ;;  %284 = vperm.xlu1 %733, %v222_v9   ;;  %v413_v21 = vld [vmem:[%s939_s4 + $0x98] sm:$0xff]  ;;  %v569_v25 = vld [vmem:[%s939_s4 + $0xa0] sm:$0xff]  ;;  %p767_p3 = por %p766_p2, %p765_p1 }
   0xc   :  { %v223_v31 = vld [vmem:[%s939_s4 + $0x60] sm:$0xff] }
   0xd   :  { %v406_v48 = vld [vmem:[%s938_s3] sm:$0xff]  ;;  %p768_p4 = pnand %p767_p3, %p761_p0 }
   0xe   :  { %711 = vmatprep.mubr.msk.f32.mxu0 %vm434_vm3, %v406_v48 }
   0xf   :  { %229 = vperm.xlu1 %733, %v211_v10  }
  0x13   :  { %234 = vperm.xlu1 %733, %v212_v11  }
  0x17   :  { %249 = vperm.xlu1 %733, %v215_v12  }
  0x1b   :  { %254 = vperm.xlu1 %733, %v216_v13  }
  0x1f   :  { %239 = vperm.xlu1 %733, %v213_v14  }
  0x23   :  { %259 = vperm.xlu1 %733, %v217_v15  }
  0x27   :  { %244 = vperm.xlu1 %733, %v214_v16  }
  0x2b   :  { %264 = vperm.xlu1 %733, %v218_v17  }
  0x2f   :  { %294 = vperm.xlu1 %733, %v224_v18  }
  0x33   :  { %299 = vperm.xlu1 %733, %v225_v19  }
  0x37   :  { %304 = vperm.xlu1 %733, %v226_v20  }
  0x3b   :  { %431 = vperm.xlu1 %733, %v413_v21  }
  0x3f   :  { %426 = vperm.xlu1 %733, %v412_v22  }
  0x43   :  { %421 = vperm.xlu1 %733, %v411_v23  }
  0x47   :  { %416 = vperm.xlu1 %733, %v410_v24  }
  0x4b   :  { %572 = vperm.xlu1 %733, %v569_v25  }
  0x82   :  { %v270_v32 = vpop.permute.xlu0 %269  ;;  %v280_v42 = vpop.permute.xlu1 %279 }
  0x86   :  { %v275_v33 = vpop.permute.xlu0 %274  ;;  %v285_v44 = vpop.permute.xlu1 %284 }
  0x8a   :  { %v230_v46 = vpop.permute.xlu1 %229 }
  0x8e   :  { %v235_v49 = vpop.permute.xlu1 %234 }
  0x92   :  { %v250_v56 = vpop.permute.xlu1 %249 }
  0x96   :  { %v255_v60 = vpop.permute.xlu1 %254 }
  0x9a   :  { %v240_v61 = vpop.permute.xlu1 %239 }
  0x9e   :  { %v260_v0 = vpop.permute.xlu1 %259 }
  0xa2   :  { %v245_v8 = vpop.permute.xlu1 %244 }
  0xa6   :  { %v265_v10 = vpop.permute.xlu1 %264 }
  0xaa   :  { %v295_v18 = vpop.permute.xlu1 %294 }
  0xc5   :  { %v99_v26 = vpop.f32.mrf.mxu0  ;;  %v175_v27 = vpop.f32.mrf.mxu1 }
  0xc6   :  { %v176_v28 = vadd.f32 %v175_v27, %v99_v26 }
  0xc7   :  { %v697_v29 = vpop.f32.mrf.mxu0  ;;  %v702_v30 = vpop.f32.mrf.mxu1 }
  0xc8   :  { %179 = vxpose.xlu0.b32.start.end [1/1] (short) %v176_v28, 128 }
 0x12d   :  { %289 = vperm.xlu0 %732, %v223_v31  }
 0x144   :  { %v195_v34 = vpop.trf.xlu0 }
 0x145   :  { %v307_v17 = vadd.f32 %v230_v46, %v195_v34 }
 0x148   :  { %v196_v35 = vpop.trf.xlu0 }
 0x149   :  { %v308_v12 = vadd.f32 %v235_v49, %v196_v35 }
 0x14c   :  { %v197_v36 = vpop.trf.xlu0 }
 0x14d   :  { %v309_v14 = vadd.f32 %v240_v61, %v197_v36 }
 0x150   :  { %v198_v37 = vpop.trf.xlu0 }
 0x151   :  { %v310_v21 = vadd.f32 %v245_v8, %v198_v37 }
 0x154   :  { %v199_v38 = vpop.trf.xlu0 }
 0x155   :  { %v311_v20 = vadd.f32 %v250_v56, %v199_v38 }
 0x157   :  { %v347_v29 = vsub.f32 %v307_v17, %v311_v20 }
 0x158   :  { %v200_v39 = vpop.trf.xlu0 }
 0x159   :  { %v312_v13 = vadd.f32 %v255_v60, %v200_v39 }
 0x15b   :  { %v348_v22 = vsub.f32 %v308_v12, %v312_v13 }
 0x15c   :  { %v201_v40 = vpop.trf.xlu0 }
 0x15d   :  { %v313_v15 = vadd.f32 %v260_v0, %v201_v40 }
 0x15f   :  { %v349_v26 = vsub.f32 %v309_v14, %v313_v15 }
 0x160   :  { %v202_v41 = vpop.trf.xlu0 }
 0x161   :  { %v314_v23 = vadd.f32 %v265_v10, %v202_v41 }
 0x163   :  { %v350_v30 = vsub.f32 %v310_v21, %v314_v23 }
 0x164   :  { %v203_v43 = vpop.trf.xlu0 }
 0x165   :  { %v315_v53 = vadd.f32 %v270_v32, %v203_v43  ;;  %v300_v32 = vpop.permute.xlu1 %299 }
 0x167   :  { %v667_v58 = vmul.f32 -1.442695, %v315_v53 }
 0x168   :  { %v204_v45 = vpop.trf.xlu0 }
 0x169   :  { %v316_v50 = vadd.f32 %v275_v33, %v204_v45  ;;  %v305_v45 = vpop.permute.xlu1 %304 }
 0x16b   :  { %v668_v54 = vmul.f32 -1.442695, %v316_v50 }
 0x16c   :  { %v205_v47 = vpop.trf.xlu0 }
 0x16d   :  { %v317_v52 = vadd.f32 %v280_v42, %v205_v47  ;;  %734 = vpow2.f32 %v668_v54 }
 0x16f   :  { %v669_v57 = vmul.f32 -1.442695, %v317_v52 }
 0x170   :  { %v206_v51 = vpop.trf.xlu0 }
 0x171   :  { %v318_v55 = vadd.f32 %v285_v44, %v206_v51  ;;  %736 = vpow2.f32 %v669_v57 }
 0x172   :  { %738 = vpow2.f32 %v667_v58 }
 0x173   :  { %v670_v59 = vmul.f32 -1.442695, %v318_v55 }
 0x174   :  { %v207_v9 = vpop.trf.xlu0 }
 0x175   :  { %740 = vpow2.f32 %v670_v59 }
 0x178   :  { %v208_v11 = vpop.trf.xlu0 }
 0x179   :  { %v320_v34 = vadd.f32 %v295_v18, %v208_v11 }
 0x17a   :  { %v735_v62 = vpop.eup %734 }
 0x17b   :  { %v336_v3 = vadd.f32 1.0, %v735_v62 }
 0x17c   :  { %v209_v19 = vpop.trf.xlu0 }
 0x17d   :  { %742 = vrcp.f32 %v336_v3  ;;  %v321_v42 = vadd.f32 %v300_v32, %v209_v19  ;;  %v432_v32 = vpop.permute.xlu1 %431 }
 0x17e   :  { %v737_v63 = vpop.eup %736 }
 0x17f   :  { %v739_v2 = vpop.eup %738  ;;  %v337_v5 = vadd.f32 1.0, %v737_v63 }
 0x180   :  { %v335_v6 = vadd.f32 1.0, %v739_v2  ;;  %v210_v33 = vpop.trf.xlu0 }
 0x181   :  { %744 = vrcp.f32 %v337_v5  ;;  %v322_v47 = vadd.f32 %v305_v45, %v210_v33  ;;  %v427_v33 = vpop.permute.xlu1 %426 }
 0x182   :  { %v741_v4 = vpop.eup %740  ;;  %746 = vrcp.f32 %v335_v6 }
 0x183   :  { %v338_v7 = vadd.f32 1.0, %v741_v4 }
 0x185   :  { %748 = vrcp.f32 %v338_v7 }
 0x18a   :  { %v743_v16 = vpop.eup %742 }
 0x18b   :  { %v352_v27 = vmul.f32 %v743_v16, %v348_v22 }
 0x18d   :  { %v356_v35 = vadd.f32 %v352_v27, %v312_v13 }
 0x18e   :  { %v745_v24 = vpop.eup %744 }
 0x18f   :  { %v747_v25 = vpop.eup %746  ;;  %v353_v31 = vmul.f32 %v745_v24, %v349_v26  ;;  %v360_v37 = vadd.f32 %v356_v35, %v320_v34  ;;  %v422_v35 = vpop.permute.xlu1 %421 }
 0x190   :  { %v351_v39 = vmul.f32 %v747_v25, %v347_v29  ;;  %v407_v29 = vld [vmem:[%s938_s3 + $0x8] sm:$0xff] }
 0x191   :  { %v357_v40 = vadd.f32 %v353_v31, %v313_v15  ;;  %v365_v49 = vsel %vm363_vm4, %v360_v37, 0.0  ;;  %v409_v31 = vld [vmem:[%s938_s3 + $0x18] sm:$0xff] }
 0x192   :  { %v749_v28 = vpop.eup %748  ;;  %v355_v41 = vadd.f32 %v351_v39, %v311_v20 }
 0x193   :  { %v354_v36 = vmul.f32 %v749_v28, %v350_v30  ;;  %v361_v46 = vadd.f32 %v357_v40, %v321_v42  ;;  %v408_v30 = vld [vmem:[%s938_s3 + $0x10] sm:$0xff]  ;;  %v417_v34 = vpop.permute.xlu1 %416 }
 0x195   :  { %v358_v43 = vadd.f32 %v354_v36, %v314_v23  ;;  %v367_v53 = vsel %vm363_vm4, %v361_v46, 0.0 }
 0x197   :  { %v362_v50 = vadd.f32 %v358_v43, %v322_v47 }
 0x199   :  { %v369_v55 = vsel %vm363_vm4, %v362_v50, 0.0 }
 0x1a8   :  { %v290_v38 = vpop.permute.xlu0 %289 }
 0x1a9   :  { %v319_v44 = vadd.f32 %v290_v38, %v207_v9 }
 0x1ab   :  { %v359_v48 = vadd.f32 %v355_v41, %v319_v44 }
 0x1ad   :  { %v364_v51 = vsel %vm363_vm4, %v359_v48, 0.0 }
 0x1ae   :  { %v366_v52 = vadd.f32 %v365_v49, %v364_v51 }
 0x1b0   :  { %v368_v54 = vadd.f32 %v367_v53, %v366_v52 }
 0x1b2   :  { %v370_v56 = vadd.f32 %v369_v55, %v368_v54 }
 0x1b4   :  { %v371_v57 = vrot.slane %v370_v56, 4 }
 0x1b6   :  { %v372_v58 = vadd.f32 %v371_v57, %v370_v56 }
 0x1b8   :  { %v373_v59 = vrot.slane %v372_v58, 2 }
 0x1ba   :  { %v374_v60 = vadd.f32 %v373_v59, %v372_v58 }
 0x1bc   :  { %v375_v61 = vrot.slane %v374_v60, 1 }
 0x1be   :  { %v376_v62 = vadd.f32 %v375_v61, %v374_v60 }
 0x1c0   :  { %v377_v63 = vmul.f32 0.03125, %v376_v62 }
 0x1c2   :  { %v378_v0 = vsub.f32 %v359_v48, %v377_v63  ;;  %v379_v2 = vsub.f32 %v360_v37, %v377_v63  ;;  %v380_v3 = vsub.f32 %v361_v46, %v377_v63  ;;  %v381_v4 = vsub.f32 %v362_v50, %v377_v63 }
 0x1c4   :  { %v382_v5 = vmul.f32 %v378_v0, %v378_v0  ;;  %v383_v6 = vmul.f32 %v379_v2, %v379_v2  ;;  %v384_v7 = vmul.f32 %v380_v3, %v380_v3  ;;  %v385_v10 = vmul.f32 %v381_v4, %v381_v4 }
 0x1c6   :  { %v386_v8 = vsel %vm363_vm4, %v382_v5, 0.0  ;;  %v387_v9 = vsel %vm363_vm4, %v383_v6, 0.0  ;;  %v389_v12 = vsel %vm363_vm4, %v384_v7, 0.0  ;;  %v391_v14 = vsel %vm363_vm4, %v385_v10, 0.0 }
 0x1c7   :  { %v388_v11 = vadd.f32 %v387_v9, %v386_v8 }
 0x1c9   :  { %v390_v13 = vadd.f32 %v389_v12, %v388_v11 }
 0x1cb   :  { %v392_v15 = vadd.f32 %v391_v14, %v390_v13 }
 0x1cd   :  { %v393_v16 = vrot.slane %v392_v15, 4 }
 0x1cf   :  { %v394_v17 = vadd.f32 %v393_v16, %v392_v15 }
 0x1d1   :  { %v395_v18 = vrot.slane %v394_v17, 2 }
 0x1d3   :  { %v396_v19 = vadd.f32 %v395_v18, %v394_v17  ;;  %v568_v17 = vld [vmem:[%s938_s3 + $0x20] sm:$0xff]  ;;  %v573_v18 = vpop.permute.xlu1 %572 }
 0x1d5   :  { %v397_v20 = vrot.slane %v396_v19, 1 }
 0x1d7   :  { %v398_v21 = vadd.f32 %v397_v20, %v396_v19 }
 0x1d9   :  { %v399_v22 = vmul.f32 0.03125, %v398_v21 }
 0x1db   :  { %v400_v23 = vadd.f32 1e-05, %v399_v22 }
 0x1dd   :  { %750 = vrsqrt.f32 %v400_v23 }
 0x1ea   :  { %v751_v24 = vpop.eup %750 }
 0x1eb   :  { %v405_v25 = vmul.f32 %v751_v24, %v381_v4  ;;  %v404_v26 = vmul.f32 %v751_v24, %v380_v3  ;;  %v403_v27 = vmul.f32 %v751_v24, %v379_v2  ;;  %v402_v28 = vmul.f32 %v751_v24, %v378_v0 }
 0x1ed   :  { %703 = vmatprep.subr.mxu0 %v405_v25 }
 0x1ee   :  { %704 = vmatpush3.msra.mxu0 %v405_v25 }
 0x1ef   :  { %705 = vmatprep.subr.mxu0 %v404_v26 }
 0x1f0   :  { %706 = vmatpush3.msra.mxu0 %v404_v26 }
 0x1f1   :  { %707 = vmatprep.subr.mxu0 %v403_v27 }
 0x1f2   :  { %708 = vmatpush3.msra.mxu0 %v403_v27 }
 0x1f3   :  { %709 = vmatprep.subr.mxu0 %v402_v28 }
 0x1f4   :  { %710 = vmatpush3.msra.mxu0 %v402_v28 }
 0x1f5   :  { %712 = vmatmul.mubr.msk.f32.vlgmr.msra.gmra.mxu0 %vm434_vm3, %v407_v29 }
 0x1f6   :  { %714 = vmatprep.mubr.msk.f32.mxu0 %vm434_vm3, %v408_v30 }
 0x1f9   :  { %715 = vmatmul.mubr.msk.f32.gmra.mxu0 %vm434_vm3, %v409_v31 }
 0x2b5   :  { %v713_v36 = vpop.f32.mrf.mxu0 }
 0x2b6   :  { %v519_v39 = vadd.f32 %v713_v36, %v422_v35 }
 0x2b7   :  { %v513_v40 = vpop.f32.mrf.mxu0 }
 0x2b8   :  { %v537_v42 = vmul.f32 0.044715, %v519_v39  ;;  %v514_v38 = vadd.f32 %v513_v40, %v417_v34  ;;  %v533_v12 = vmul.f32 0.5, %v519_v39 }
 0x2b9   :  { %v716_v37 = vpop.f32.mrf.mxu0 }
 0x2ba   :  { %v541_v43 = vmul.f32 %v537_v42, %v519_v39  ;;  %v536_v41 = vmul.f32 0.044715, %v514_v38  ;;  %v529_v44 = vadd.f32 %v716_v37, %v432_v32  ;;  %v532_v15 = vmul.f32 0.5, %v514_v38 }
 0x2bb   :  { %v523_v45 = vpop.f32.mrf.mxu0 }
 0x2bc   :  { %v545_v46 = vmul.f32 %v541_v43, %v519_v39  ;;  %v540_v47 = vmul.f32 %v536_v41, %v514_v38  ;;  %v539_v48 = vmul.f32 0.044715, %v529_v44  ;;  %v524_v49 = vadd.f32 %v523_v45, %v427_v33 }
 0x2bd   :  { %v535_v4 = vmul.f32 0.5, %v529_v44 }
 0x2be   :  { %v549_v50 = vadd.f32 %v545_v46, %v519_v39  ;;  %v544_v51 = vmul.f32 %v540_v47, %v514_v38  ;;  %v543_v52 = vmul.f32 %v539_v48, %v529_v44  ;;  %v538_v53 = vmul.f32 0.044715, %v524_v49 }
 0x2bf   :  { %v534_v8 = vmul.f32 0.5, %v524_v49 }
 0x2c0   :  { %v548_v54 = vadd.f32 %v544_v51, %v514_v38  ;;  %v547_v55 = vmul.f32 %v543_v52, %v529_v44  ;;  %v542_v56 = vmul.f32 %v538_v53, %v524_v49  ;;  %v553_v57 = vmul.f32 0.7978846, %v549_v50 }
 0x2c2   :  { %v551_v58 = vadd.f32 %v547_v55, %v529_v44  ;;  %v546_v59 = vmul.f32 %v542_v56, %v524_v49  ;;  %v552_v60 = vmul.f32 0.7978846, %v548_v54  ;;  %752 = vtanh.f32 %v553_v57 }
 0x2c4   :  { %v550_v61 = vadd.f32 %v546_v59, %v524_v49  ;;  %v555_v62 = vmul.f32 0.7978846, %v551_v58 }
 0x2c6   :  { %754 = vtanh.f32 %v555_v62  ;;  %v554_v63 = vmul.f32 0.7978846, %v550_v61 }
 0x2c7   :  { %756 = vtanh.f32 %v552_v60 }
 0x2c8   :  { %758 = vtanh.f32 %v554_v63 }
 0x2cf   :  { %v753_v0 = vpop.eup %752 }
 0x2d0   :  { %v561_v10 = vadd.f32 1.0, %v753_v0 }
 0x2d2   :  { %v565_v14 = vmul.f32 %v561_v10, %v533_v12 }
 0x2d3   :  { %v755_v2 = vpop.eup %754 }
 0x2d4   :  { %v757_v3 = vpop.eup %756  ;;  %v563_v5 = vadd.f32 1.0, %v755_v2 }
 0x2d5   :  { %v759_v6 = vpop.eup %758  ;;  %v560_v13 = vadd.f32 1.0, %v757_v3 }
 0x2d6   :  { %v567_v7 = vmul.f32 %v563_v5, %v535_v4  ;;  %v562_v9 = vadd.f32 1.0, %v759_v6 }
 0x2d7   :  { %v564_v16 = vmul.f32 %v560_v13, %v532_v15 }
 0x2d8   :  { %718 = vmatpush3.msra.mxu1 %v567_v7  ;;  %v566_v11 = vmul.f32 %v562_v9, %v534_v8 }
 0x2d9   :  { %719 = vmatprep.subr.mxu1 %v782_v1 }
 0x2da   :  { %720 = vmatpush3.msra.mxu1 %v566_v11 }
 0x2db   :  { %721 = vmatprep.subr.mxu1 %v782_v1 }
 0x2dc   :  { %722 = vmatpush3.msra.mxu1 %v565_v14 }
 0x2dd   :  { %723 = vmatprep.subr.mxu1 %v782_v1 }
 0x2de   :  { %724 = vmatpush3.msra.mxu1 %v564_v16 }
 0x2df   :  { %726 = vmatmul.mubr.msk.f32.vlgmr.msra.gmra.mxu1 %vm434_vm3, %v568_v17 }
 0x39f   :  { %v644_v19 = vpop.f32.mrf.mxu1 }
 0x3a0   :  { %v645_v20 = vadd.f32 %v644_v19, %v573_v18 }
 0x3a1   :  { %v727_v21 = vpop.f32.mrf.mxu1 }
 0x3a2   :  { %648 = vst.msk [vmem:[#allocation2] sm:$0xff] %vm363_vm4, %v645_v20 }
 0x3a3   :  { %771 = shalt.err (!%p768_p4)
}
 0x3a4   :  { %658 = dma.vmem_to_hbm [thread:$0]  %s656_s22, 128, %s940_s5, [#allocation3]  }
 0x3a5   :  { %780 = dma.done.wait [#allocation3], 128  }
 0x3a6   :  { %781 = vsyncadd [#allocation3], 4294967168 }
 0x3a7   :  { %662 = vsyncpa [#allocation3], 1 }

// kernel: tpu_custom_call.1
= control target key start
LH: loop header
LB: loop body
LE: loop exit
PB: predicated region body
PF: predicated region fallthrough
CT: control target
= control target key end

     0   :  { %9 = vsyncpa [#allocation3], 0  ;;  %s627_s0 = inlined_call_operand.hbm [shape: f32[8,16], index: 0, kind: input, shape index: {}]   ;;  %s628_s1 = inlined_call_operand.hbm [shape: f32[16,128], index: 1, kind: input, shape index: {}]   ;;  %s629_s2 = inlined_call_operand.hbm [shape: f32[32,40], index: 2, kind: input, shape index: {}]   ;;  %s630_s3 = inlined_call_operand.vmem [shape: f32[3,128], index: 3, kind: input, shape index: {}]   ;;  %s631_s4 = inlined_call_operand.hbm [shape: f32[8,8], index: 4, kind: output, shape index: {}]  }
   0x1   :  { %10 = vsyncpa [#allocation6], 0 }
   0x2   :  { %11 = vsyncpa [#allocation4], 0  ;;  %s545_s15 = smov [#allocation5]  }
   0x3   :  { %s27_s16 = sshll.u32 %s545_s15, 4  ;;  %s28_s16 = int_to_ptr.vmem [resolvable:$true] %s27_s16 }
   0x4   :  { %s467_s17 = scalar_lea.vmem %s28_s16, 256  ;;  %p472_p1 = scmp.lt.s32.totalorder %s28_s16, %s28_s16 }
   0x5   :  { %p468_p0 = scmp.ne.s32.totalorder %s28_s16, %s467_s17  ;;  %p473_p2 = scmp.lt.s32.totalorder %s467_s17, %s467_s17 }
   0x7   :  { %p474_p3 = por %p473_p2, %p472_p1 }
   0x9   :  { %p475_p4 = pnand %p474_p3, %p468_p0 }
   0xb   :  { %478 = shalt.err (!%p475_p4)
}
   0xc   :  { %s546_s18 = smov 128   ;;  %s547_s19 = smov 8  }
   0xd   :  { %33 = dma.hbm_to_vmem [thread:$0]  %s628_s1, 256, %s28_s16, [#allocation6], %s546_s18, %s546_s18, %s547_s19  }
   0xe   :  { %s548_s22 = smov [#allocation2]   ;;  %s549_s24 = smov [#allocation7]  }
   0xf   :  { %s18_s23 = sshll.u32 %s548_s22, 4  ;;  %s39_s25 = sshll.u32 %s549_s24, 4  ;;  %s19_s23 = int_to_ptr.vmem [resolvable:$true] %s18_s23  ;;  %s40_s25 = int_to_ptr.vmem [resolvable:$true] %s39_s25 }
  0x10   :  { %s487_s26 = scalar_lea.vmem %s19_s23, 128  ;;  %p492_p6 = scmp.lt.s32.totalorder %s19_s23, %s19_s23 }
  0x11   :  { %p488_p5 = scmp.ne.s32.totalorder %s19_s23, %s487_s26  ;;  %p493_p7 = scmp.lt.s32.totalorder %s487_s26, %s487_s26 }
  0x13   :  { %p494_p8 = por %p493_p7, %p492_p6 }
  0x15   :  { %p495_p9 = pnand %p494_p8, %p488_p5 }
  0x17   :  { %498 = shalt.err (!%p495_p9)
}
  0x18   :  { %21 = dma.hbm_to_vmem [thread:$0]  %s627_s0, 128, %s19_s23, [#allocation3]  }
  0x19   :  { %s507_s29 = scalar_lea.vmem %s40_s25, 512  ;;  %p512_p11 = scmp.lt.s32.totalorder %s40_s25, %s40_s25 }
  0x1a   :  { %p508_p10 = scmp.ne.s32.totalorder %s40_s25, %s507_s29  ;;  %p513_p12 = scmp.lt.s32.totalorder %s507_s29, %s507_s29 }
  0x1c   :  { %p514_p13 = por %p513_p12, %p512_p11 }
  0x1e   :  { %p515_p0 = pnand %p514_p13, %p508_p10 }
  0x20   :  { %518 = shalt.err (!%p515_p0)
}
  0x21   :  { %45 = dma.hbm_to_vmem [thread:$0]  %s629_s2, 512, %s40_s25, [#allocation6], %s546_s18, %s546_s18, %s547_s19  }
  0x22   :  { %539 = dma.done.wait [#allocation3], 128  }
  0x23   :  { %540 = vsyncadd [#allocation3], 4294967168 }
  0x24   :  { %541 = dma.done.wait [#allocation6], 768  }
  0x25   :  { %542 = vsyncadd [#allocation6], 4294966528  ;;  %v550_v0 = vmov 0.0   ;;  %vm551_vm0 = vmmov 0   ;;  %v59_v1 = vld [vmem:[#allocation5 + $0x8] sm:$0xff]  ;;  %v58_v2 = vld [vmem:[#allocation5] sm:$0xff] }
  0x26   :  { %412 = vmatprep.subr.mxu0 %v550_v0  ;;  %416 = vmatprep.mubr.msk.f32.mxu0 %vm551_vm0, %v550_v0  ;;  %v57_v3 = vld [vmem:[#allocation2] sm:$0xff]  ;;  %vm65_vm1 = vcmask 130048   ;;  %s552_s5 = smov 96   ;;  %s553_s6 = smov 64   ;;  %vm168_vm2 = vcmask 261120   ;;  %v190_v28 = vld [vmem:[#allocation7 + $0x18] sm:$0xff] }
  0x27   :  { %419 = vmatprep.subr.mxu1 %v550_v0  ;;  %427 = vmatprep.mubr.msk.f32.mxu1 %vm551_vm0, %v550_v0  ;;  %v392_v4 = vld [vmem:[%s630_s3] ss:$0 sm:$0xff]  ;;  %v189_v29 = vld [vmem:[#allocation7 + $0x10] sm:$0xff]  ;;  %v187_v31 = vld [vmem:[#allocation7] sm:$0xff]  ;;  %s554_s11 = smov [#allocation8]   ;;  %vm374_vm3 = vcmask 64512  }
  0x28   :  { %413 = vmatpush3.msra.mxu0 %v59_v1  ;;  %420 = vmatpush3.msra.mxu1 %v190_v28  ;;  %v188_v30 = vld [vmem:[#allocation7 + $0x8] sm:$0xff]  ;;  %s382_s12 = sshll.u32 %s554_s11, 4  ;;  %s383_s12 = int_to_ptr.vmem [resolvable:$true] %s382_s12 }
  0x29   :  { %414 = vmatprep.subr.mxu0 %v550_v0  ;;  %421 = vmatprep.subr.mxu1 %v550_v0  ;;  %v395_v42 = vld [vmem:[%s630_s3 + $0x1] ss:$0 sm:$0xff]  ;;  %v397_v55 = vld [vmem:[%s630_s3 + $0x2] ss:$0 sm:$0xff]  ;;  %s519_s13 = scalar_lea.vmem %s383_s12, 128  ;;  %p524_p2 = scmp.lt.s32.totalorder %s383_s12, %s383_s12 }
  0x2a   :  { %415 = vmatpush3.msra.mxu0 %v58_v2  ;;  %422 = vmatpush3.msra.mxu1 %v189_v29  ;;  %p520_p1 = scmp.ne.s32.totalorder %s383_s12, %s519_s13  ;;  %p525_p3 = scmp.lt.s32.totalorder %s519_s13, %s519_s13 }
  0x2b   :  { %417 = vmatmul.mubr.msk.f32.vlgmr.msra.gmra.mxu0 %vm65_vm1, %v57_v3  ;;  %430 = vmatprep.subr.mxu0 %v550_v0 }
  0x2c   :  { %438 = vmatprep.mubr.msk.f32.mxu0 %vm551_vm0, %v550_v0  ;;  %423 = vmatprep.subr.mxu1 %v550_v0  ;;  %p526_p4 = por %p525_p3, %p524_p2 }
  0x2d   :  { %424 = vmatpush3.msra.mxu1 %v188_v30 }
  0x2e   :  { %425 = vmatprep.subr.mxu1 %v550_v0  ;;  %p527_p5 = pnand %p526_p4, %p520_p1 }
  0x2f   :  { %426 = vmatpush3.msra.mxu1 %v187_v31 }
  0xeb   :  { %v135_v5 = vpop.f32.mrf.mxu0 }
  0xec   :  { %v136_v6 = vadd.f32 %v392_v4, %v135_v5 }
  0xed   :  { %v418_v7 = vpop.f32.mrf.mxu0 }
  0xee   :  { %146 = vrot.lane.b32.xlu0 %v136_v6, %s552_s5  ;;  %v394_v10 = vmul.f32 -1.442695, %v136_v6 }
  0xf0   :  { %451 = vpow2.f32 %v394_v10 }
  0xfd   :  { %v452_v11 = vpop.eup %451 }
  0xfe   :  { %v142_v12 = vadd.f32 1.0, %v452_v11 }
 0x100   :  { %453 = vrcp.f32 %v142_v12 }
 0x10d   :  { %v454_v13 = vpop.eup %453 }
 0x160   :  { %v147_v8 = vpop.permute.xlu0 %146 }
 0x161   :  { %v149_v9 = vsub.f32 %v136_v6, %v147_v8 }
 0x163   :  { %151 = vrot.lane.b32.xlu0 %v149_v9, %s553_s6 }
 0x1d5   :  { %v152_v14 = vpop.permute.xlu0 %151 }
 0x1d6   :  { %v154_v15 = vmul.f32 %v454_v13, %v152_v14 }
 0x1d8   :  { %156 = vrot.lane.b32.xlu1 %v154_v15, %s552_s5 }
 0x1dc   :  { %160 = vrot.lane.b32.xlu1 %v136_v6, %s553_s6 }
 0x24a   :  { %v157_v16 = vpop.permute.xlu1 %156 }
 0x24b   :  { %v159_v17 = vadd.f32 %v157_v16, %v136_v6 }
 0x24e   :  { %v161_v18 = vpop.permute.xlu1 %160 }
 0x24f   :  { %v163_v19 = vadd.f32 %v161_v18, %v159_v17 }
 0x251   :  { %165 = vrot.lane.b32.xlu0 %v163_v19, %s552_s5 }
 0x2c3   :  { %v166_v20 = vpop.permute.xlu0 %165 }
 0x2c4   :  { %v169_v21 = vsel %vm168_vm2, %v166_v20, 0.0 }
 0x2c5   :  { %170 = vadd.xlane.f32.xlu1 %v169_v21 }
 0x34e   :  { %v171_v22 = vpop.xlane.xlu1 %170 }
 0x34f   :  { %v173_v23 = vmul.f32 0.03125, %v171_v22 }
 0x351   :  { %v174_v24 = vsub.f32 %v163_v19, %v173_v23 }
 0x353   :  { %v175_v25 = vmul.f32 %v174_v24, %v174_v24 }
 0x355   :  { %177 = vrot.lane.b32.xlu0 %v175_v25, %s552_s5 }
 0x3c7   :  { %v178_v26 = vpop.permute.xlu0 %177 }
 0x3c8   :  { %v180_v27 = vsel %vm168_vm2, %v178_v26, 0.0 }
 0x3c9   :  { %181 = vadd.xlane.f32.xlu0 %v180_v27 }
 0x3df   :  { %295 = vrot.lane.b32.xlu0 %v190_v28, %s552_s5 }
 0x3e3   :  { %289 = vrot.lane.b32.xlu0 %v187_v31, %s552_s5 }
 0x452   :  { %v182_v32 = vpop.xlane.xlu0 %181 }
 0x453   :  { %v183_v33 = vmul.f32 0.03125, %v182_v32 }
 0x455   :  { %v184_v34 = vadd.f32 1e-05, %v183_v33 }
 0x456   :  { %v296_v38 = vpop.permute.xlu0 %295 }
 0x457   :  { %455 = vrsqrt.f32 %v184_v34  ;;  %431 = vmatpush3.msra.mxu0 %v296_v38 }
 0x458   :  { %432 = vmatprep.subr.mxu0 %v550_v0 }
 0x45a   :  { %v290_v41 = vpop.permute.xlu0 %289 }
 0x464   :  { %v456_v35 = vpop.eup %455 }
 0x465   :  { %v186_v36 = vmul.f32 %v456_v35, %v174_v24 }
 0x467   :  { %197 = vrot.lane.b32.xlu1 %v186_v36, %s552_s5 }
 0x46b   :  { %293 = vrot.lane.b32.xlu1 %v189_v29, %s552_s5 }
 0x46f   :  { %291 = vrot.lane.b32.xlu1 %v188_v30, %s552_s5 }
 0x4d9   :  { %v198_v37 = vpop.permute.xlu1 %197 }
 0x4da   :  { %428 = vmatmul.mubr.msk.f32.vlgmr.msra.gmra.mxu1 %vm168_vm2, %v198_v37 }
 0x4dd   :  { %v294_v39 = vpop.permute.xlu1 %293 }
 0x4de   :  { %433 = vmatpush3.msra.mxu0 %v294_v39 }
 0x4df   :  { %434 = vmatprep.subr.mxu0 %v550_v0 }
 0x4e1   :  { %v292_v40 = vpop.permute.xlu1 %291 }
 0x4e2   :  { %435 = vmatpush3.msra.mxu0 %v292_v40 }
 0x4e3   :  { %436 = vmatprep.subr.mxu0 %v550_v0 }
 0x4e4   :  { %437 = vmatpush3.msra.mxu0 %v290_v41 }
 0x59a   :  { %v267_v43 = vpop.f32.mrf.mxu1 }
 0x59b   :  { %v268_v44 = vadd.f32 %v395_v42, %v267_v43 }
 0x59c   :  { %v429_v45 = vpop.f32.mrf.mxu1 }
 0x59d   :  { %v272_v46 = vmul.f32 0.044715, %v268_v44  ;;  %v271_v52 = vmul.f32 0.5, %v268_v44 }
 0x59f   :  { %v273_v47 = vmul.f32 %v272_v46, %v268_v44 }
 0x5a1   :  { %v274_v48 = vmul.f32 %v273_v47, %v268_v44 }
 0x5a3   :  { %v275_v49 = vadd.f32 %v274_v48, %v268_v44 }
 0x5a5   :  { %v276_v50 = vmul.f32 0.7978846, %v275_v49 }
 0x5a7   :  { %457 = vtanh.f32 %v276_v50 }
 0x5b4   :  { %v458_v51 = vpop.eup %457 }
 0x5b5   :  { %v278_v53 = vadd.f32 1.0, %v458_v51 }
 0x5b7   :  { %v279_v54 = vmul.f32 %v278_v53, %v271_v52 }
 0x5b9   :  { %439 = vmatmul.mubr.msk.f32.vlgmr.msra.gmra.mxu0 %vm168_vm2, %v279_v54 }
 0x679   :  { %v370_v56 = vpop.f32.mrf.mxu0 }
 0x67a   :  { %v371_v57 = vadd.f32 %v397_v55, %v370_v56 }
 0x67b   :  { %v440_v58 = vpop.f32.mrf.mxu0 }
 0x67c   :  { %375 = vst.msk [vmem:[#allocation8] sm:$0xff] %vm374_vm3, %v371_v57 }
 0x67d   :  { %530 = shalt.err (!%p527_p5)
}
 0x67e   :  { %385 = dma.vmem_to_hbm [thread:$0]  %s383_s12, 128, %s631_s4, [#allocation4]  }
 0x67f   :  { %543 = dma.done.wait [#allocation4], 128  }
 0x680   :  { %544 = vsyncadd [#allocation4], 4294967168 }
 0x681   :  { %389 = vsyncpa [#allocation3], 1 }
 0x682   :  { %390 = vsyncpa [#allocation6], 1 }
 0x683   :  { %391 = vsyncpa [#allocation4], 1 }

</bundles_post_ra>
